<compile_context>
chip_gen: v5e
topology: v5e:2x2
jax: 0.10.0
libtpu: 0.0.40
codegen_flags: <defaults>
</compile_context>

<pallas_src>
import jax
import jax.numpy as jnp
from jax import lax
from jax.experimental import pallas as pl
from jax.experimental.pallas import tpu as pltpu


def _temporal_attention_kernel(hs_ref, dhc_ref,
                               w1hc_ref, w1x_ref, b1_ref,
                               w2_ref,
                               out_ref):
    hs = hs_ref[...]                                    # (Bb, T, m) f32
    dhc = dhc_ref[...]                                  # (Bb, 2p)
    Bb, T, m = hs.shape

    # ---- FC1 on the virtual concat [dh | dc | hs] (never materialized) ----
    # Hidden-state part: one MXU matmul over the flattened (Bb*T, m) slab.
    # With T a multiple of 8 (sublane count) the collapse/expand reshapes are
    # layout no-ops; the 2-D dot_general is the safest-lowering MXU form.
    zx = lax.dot_general(hs.reshape(Bb * T, m), w1x_ref[...],
                         (((1,), (0,)), ((), ())),
                         preferred_element_type=jnp.float32,
                         precision=lax.Precision.HIGHEST)          # (Bb*T, m)
    # Decoder-state part: fused [dh|dc] @ W1hc^T with b1 folded in once per
    # row (instead of being re-added T times on the (Bb, T, m) slab).
    zd = lax.dot_general(dhc, w1hc_ref[...],
                         (((1,), (0,)), ((), ())),
                         preferred_element_type=jnp.float32,
                         precision=lax.Precision.HIGHEST) + b1_ref[...]  # (Bb, m)
    z = jnp.tanh(zx.reshape(Bb, T, m) + zd[:, None, :])            # (Bb, T, m)

    # ---- FC2 (m -> 1) as VPU mul + lane reduce (no degenerate MXU matmul).
    # b2 is dropped: softmax over T is invariant to a scalar shift (exact).
    s = jnp.sum(z * w2_ref[...], axis=-1)                          # (Bb, T)

    # ---- Softmax over the time axis, kept lane-dense in (Bb, T) ----
    s = s - jnp.max(s, axis=-1, keepdims=True)
    e = jnp.exp(s)
    alpha = e / jnp.sum(e, axis=-1, keepdims=True)                 # exact

    # ---- Context vector: sum_t alpha_t * hs_t ----
    ctx = jnp.sum(hs * alpha[:, :, None], axis=1)                  # (Bb, m)
    out_ref[...] = ctx.astype(out_ref.dtype)


def _pick_block_b(B, T, m, p, vmem_budget_bytes):
    """Largest multiple-of-8 batch block whose per-step working set fits."""
    # Per-row f32 VMEM: double-buffered hs tile (2*T*m) + FC1/tanh
    # intermediates (~2*T*m) + dhc/out tiles + softmax temps.
    bytes_per_row = 4 * (4 * T * m + 2 * m + 4 * p + 4 * T)
    cap = (vmem_budget_bytes // max(1, bytes_per_row)) // 8 * 8
    return max(8, cap)


def temporal_attention(hidden_states, de_hidden, de_cell, params,
                       time_step=None, block_b=None):
    """hidden_states: (B, T, m), de_hidden/de_cell: (B, p) -> context (B, m).

    `time_step` is accepted for parity with the PyTorch forward but unused
    (the reference module never reads it).
    """
    del time_step
    B, T, m = hidden_states.shape
    p = de_hidden.shape[1]

    W1, b1, W2 = params["W1"], params["b1"], params["W2"]
    # Split FC1 weight (m, 2p+m) into [decoder-states | hidden] pieces,
    # pre-transposed so the kernel does plain row-major matmuls.
    w1hc = W1[:, :2 * p].T            # (2p, m)  fused [dh|dc] weight
    w1x = W1[:, 2 * p:].T             # (m, m)
    b1r = b1.reshape(1, m)            # (1, m)
    w2r = W2.reshape(1, m)            # (1, m)  FC2 row for VPU mul + reduce
    # params["b2"] intentionally unused: softmax(z + b2) == softmax(z).

    # Fuse the two decoder-state vectors into one operand.
    dhc = jnp.concatenate([de_hidden, de_cell], axis=1)   # (B, 2p)

    # Keep the per-step working set well under the v7x scoped-VMEM default
    # (32 MiB); v5e/v6e have >= 2x more headroom, so the same cap is safe.
    vmem_limit_bytes = 32 * 1024 * 1024
    if block_b is None:
        cap = _pick_block_b(B, T, m, p, vmem_budget_bytes=16 * 1024 * 1024)
        # Single grid step when everything fits; otherwise large 8-aligned
        # blocks amortize the ~0.35us/step overhead and fill the MXU M dim.
        block_b = B if B <= cap else cap
    block_b = max(1, min(int(block_b), B))
    if block_b < B and block_b % 8 != 0:
        # (8,128) rule: the batch axis is a second-to-last block dim for the
        # dhc / output specs, so it must be a multiple of 8 (or the full B).
        block_b = min(B, ((block_b + 7) // 8) * 8)

    grid = (pl.cdiv(B, block_b),)
    out = pl.pallas_call(
        _temporal_attention_kernel,
        out_shape=jax.ShapeDtypeStruct((B, m), hidden_states.dtype),
        grid_spec=pltpu.PrefetchScalarGridSpec(
            num_scalar_prefetch=0,
            grid=grid,
            in_specs=[
                pl.BlockSpec((block_b, T, m), lambda b: (b, 0, 0)),  # hidden_states
                pl.BlockSpec((block_b, 2 * p), lambda b: (b, 0)),    # [dh | dc]
                pl.BlockSpec((2 * p, m), lambda b: (0, 0)),          # W1hc^T (resident)
                pl.BlockSpec((m, m), lambda b: (0, 0)),              # W1x^T  (resident)
                pl.BlockSpec((1, m), lambda b: (0, 0)),              # b1
                pl.BlockSpec((1, m), lambda b: (0, 0)),              # W2 row
            ],
            out_specs=pl.BlockSpec((block_b, m), lambda b: (b, 0)),
        ),
        compiler_params=pltpu.CompilerParams(
            dimension_semantics=("parallel",),
            vmem_limit_bytes=vmem_limit_bytes),
    )(hidden_states, dhc, w1hc, w1x, b1r, w2r)
    return out


def temporal_attention_ref(hidden_states, de_hidden, de_cell, params):
    """Pure-JAX reference matching the PyTorch forward exactly."""
    B, T, m = hidden_states.shape
    p = de_hidden.shape[1]
    dh = jnp.broadcast_to(de_hidden[:, None, :], (B, T, p))
    dc = jnp.broadcast_to(de_cell[:, None, :], (B, T, p))
    h_concat = jnp.concatenate([dh, dc, hidden_states], axis=2)
    z = jnp.einsum("btc,mc->btm", h_concat, params["W1"],
                   precision=lax.Precision.HIGHEST) + params["b1"]
    z = jnp.tanh(z)
    z = jnp.einsum("btm,om->bto", z, params["W2"],
                   precision=lax.Precision.HIGHEST) + params["b2"]   # (B, T, 1)
    z = jax.nn.softmax(z, axis=1)
    return jnp.sum(hidden_states * z, axis=1)


def init_params(key, T, m, p, dtype=jnp.float32):
    """Deterministic init mimicking nn.Linear default (uniform +/- 1/sqrt(fan_in))."""
    k1, k2, k3, k4 = jax.random.split(key, 4)
    fan1 = 2 * p + m
    bound1 = 1.0 / jnp.sqrt(fan1)
    bound2 = 1.0 / jnp.sqrt(m)
    return {
        "W1": jax.random.uniform(k1, (m, fan1), dtype, -bound1, bound1),
        "b1": jax.random.uniform(k2, (m,), dtype, -bound1, bound1),
        "W2": jax.random.uniform(k3, (1, m), dtype, -bound2, bound2),
        "b2": jax.random.uniform(k4, (1,), dtype, -bound2, bound2),
    }


if __name__ == "__main__":
    B, T, m, p = 2, 8, 32, 16   # batch, window_size, en_hidden_size, de_hidden_size

    key = jax.random.PRNGKey(0)
    kx, kh, kc, kp = jax.random.split(key, 4)
    hidden_states = jax.random.normal(kx, (B, T, m), jnp.float32)
    de_hidden = jax.random.normal(kh, (B, p), jnp.float32)
    de_cell = jax.random.normal(kc, (B, p), jnp.float32)
    params = init_params(kp, T, m, p)

    out = temporal_attention(hidden_states, de_hidden, de_cell, params, time_step=0)
    out = jax.block_until_ready(out)

    ref = temporal_attention_ref(hidden_states, de_hidden, de_cell, params)
    assert out.shape == (B, m)
    # Exact softmax divide + HIGHEST-precision f32 matmuls on both sides
    # restores tight agreement (the old 1e-3 slack came from the approx vrcp).
    assert jnp.allclose(out, ref, atol=1e-4, rtol=1e-4), "mismatch vs reference"

    print("KERNEL_OK")
</pallas_src>

<mosaic_0001>
module attributes {stable_mosaic.version = 11 : i64} {
  func.func @_temporal_attention_kernel(%arg0: i32, %arg1: memref<2x8x32xf32, #tpu.memory_space<vmem>>, %arg2: memref<2x32xf32, #tpu.memory_space<vmem>>, %arg3: memref<32x32xf32, #tpu.memory_space<vmem>>, %arg4: memref<32x32xf32, #tpu.memory_space<vmem>>, %arg5: memref<1x32xf32, #tpu.memory_space<vmem>>, %arg6: memref<1x32xf32, #tpu.memory_space<vmem>>, %arg7: memref<2x32xf32, #tpu.memory_space<vmem>>) attributes {dimension_semantics = [#tpu.dimension_semantics<parallel>], iteration_bounds = array<i64: 1>, scalar_prefetch = 0 : i64, scratch_operands = 0 : i64, tpu.core_type = #tpu.core_type<tc>, window_params = [{transform_indices = @transform_0, window_bounds = array<i64: 2, 8, 32>}, {transform_indices = @transform_1, window_bounds = array<i64: 2, 32>}, {pipeline_mode = #tpu.pipeline_mode<synchronous>, transform_indices = @transform_2, window_bounds = array<i64: 32, 32>}, {pipeline_mode = #tpu.pipeline_mode<synchronous>, transform_indices = @transform_3, window_bounds = array<i64: 32, 32>}, {pipeline_mode = #tpu.pipeline_mode<synchronous>, transform_indices = @transform_4, window_bounds = array<i64: 1, 32>}, {pipeline_mode = #tpu.pipeline_mode<synchronous>, transform_indices = @transform_5, window_bounds = array<i64: 1, 32>}, {transform_indices = @transform_6, window_bounds = array<i64: 2, 32>}]} {
    %c0 = arith.constant 0 : index
    %c0_0 = arith.constant 0 : index
    %c0_1 = arith.constant 0 : index
    %0 = vector.load %arg1[%c0, %c0_0, %c0_1] : memref<2x8x32xf32, #tpu.memory_space<vmem>>, vector<2x8x32xf32>
    %c0_2 = arith.constant 0 : index
    %c0_3 = arith.constant 0 : index
    %1 = vector.load %arg2[%c0_2, %c0_3] : memref<2x32xf32, #tpu.memory_space<vmem>>, vector<2x32xf32>
    %2 = vector.shape_cast %0 : vector<2x8x32xf32> to vector<16x32xf32>
    %c0_4 = arith.constant 0 : index
    %c0_5 = arith.constant 0 : index
    %3 = vector.load %arg4[%c0_4, %c0_5] : memref<32x32xf32, #tpu.memory_space<vmem>>, vector<32x32xf32>
    %cst = arith.constant dense<0.000000e+00> : vector<16x32xf32>
    %4 = tpu.matmul %2, %3, %cst {dimension_numbers = #tpu.dot_dimension_numbers<[1], [0], [0], [1], [0, 0, 1, 1], [], []>, precision = #tpu.contract_precision<fp32>} : vector<16x32xf32>, vector<32x32xf32>, vector<16x32xf32> -> vector<16x32xf32>
    %c0_6 = arith.constant 0 : index
    %c0_7 = arith.constant 0 : index
    %5 = vector.load %arg3[%c0_6, %c0_7] : memref<32x32xf32, #tpu.memory_space<vmem>>, vector<32x32xf32>
    %cst_8 = arith.constant dense<0.000000e+00> : vector<2x32xf32>
    %6 = tpu.matmul %1, %5, %cst_8 {dimension_numbers = #tpu.dot_dimension_numbers<[1], [0], [0], [1], [0, 0, 1, 1], [], []>, precision = #tpu.contract_precision<fp32>} : vector<2x32xf32>, vector<32x32xf32>, vector<2x32xf32> -> vector<2x32xf32>
    %c0_9 = arith.constant 0 : index
    %c0_10 = arith.constant 0 : index
    %7 = vector.load %arg5[%c0_9, %c0_10] : memref<1x32xf32, #tpu.memory_space<vmem>>, vector<1x32xf32>
    %8 = vector.broadcast %7 : vector<1x32xf32> to vector<2x32xf32>
    %9 = arith.addf %6, %8 : vector<2x32xf32>
    %10 = vector.shape_cast %4 : vector<16x32xf32> to vector<2x8x32xf32>
    %11 = vector.shape_cast %9 : vector<2x32xf32> to vector<2x1x32xf32>
    %12 = vector.broadcast %11 : vector<2x1x32xf32> to vector<2x8x32xf32>
    %13 = arith.addf %10, %12 : vector<2x8x32xf32>
    %14 = math.tanh %13 : vector<2x8x32xf32>
    %c0_11 = arith.constant 0 : index
    %c0_12 = arith.constant 0 : index
    %15 = vector.load %arg6[%c0_11, %c0_12] : memref<1x32xf32, #tpu.memory_space<vmem>>, vector<1x32xf32>
    %16 = vector.shape_cast %15 : vector<1x32xf32> to vector<1x1x32xf32>
    %17 = vector.broadcast %16 : vector<1x1x32xf32> to vector<2x8x32xf32>
    %18 = arith.mulf %14, %17 : vector<2x8x32xf32>
    %cst_13 = arith.constant dense<0.000000e+00> : vector<2x8xf32>
    %19 = vector.multi_reduction <add>, %18, %cst_13 [2] : vector<2x8x32xf32> to vector<2x8xf32>
    %cst_14 = arith.constant dense<0xFF800000> : vector<2xf32>
    %20 = vector.multi_reduction <maximumf>, %19, %cst_14 [1] : vector<2x8xf32> to vector<2xf32>
    %21 = vector.shape_cast %20 : vector<2xf32> to vector<2x1xf32>
    %22 = vector.broadcast %21 : vector<2x1xf32> to vector<2x8xf32>
    %23 = arith.subf %19, %22 : vector<2x8xf32>
    %24 = math.exp %23 : vector<2x8xf32>
    %cst_15 = arith.constant dense<0.000000e+00> : vector<2xf32>
    %25 = vector.multi_reduction <add>, %24, %cst_15 [1] : vector<2x8xf32> to vector<2xf32>
    %26 = vector.shape_cast %25 : vector<2xf32> to vector<2x1xf32>
    %27 = vector.broadcast %26 : vector<2x1xf32> to vector<2x8xf32>
    %28 = arith.divf %24, %27 : vector<2x8xf32>
    %29 = vector.shape_cast %28 : vector<2x8xf32> to vector<2x8x1xf32>
    %30 = vector.broadcast %29 : vector<2x8x1xf32> to vector<2x8x32xf32>
    %31 = arith.mulf %0, %30 : vector<2x8x32xf32>
    %cst_16 = arith.constant dense<0.000000e+00> : vector<2x32xf32>
    %32 = vector.multi_reduction <add>, %31, %cst_16 [1] : vector<2x8x32xf32> to vector<2x32xf32>
    %c0_17 = arith.constant 0 : index
    %c0_18 = arith.constant 0 : index
    %33 = vector.load %arg7[%c0_17, %c0_18] : memref<2x32xf32, #tpu.memory_space<vmem>>, vector<2x32xf32>
    tpu.vector_store %arg7[%c0_17, %c0_18], %32 {strides = array<i32>} : memref<2x32xf32, #tpu.memory_space<vmem>>, vector<2x32xf32>,
    return
  }
  func.func @transform_0(%arg0: i32) -> (i32, i32, i32) {
    %c0_i32 = arith.constant 0 : i32
    %c0_i32_0 = arith.constant 0 : i32
    %c0_i32_1 = arith.constant 0 : i32
    return %arg0, %c0_i32, %c0_i32_0 : i32, i32, i32
  }
  func.func @transform_1(%arg0: i32) -> (i32, i32) {
    %c0_i32 = arith.constant 0 : i32
    %c0_i32_0 = arith.constant 0 : i32
    return %arg0, %c0_i32 : i32, i32
  }
  func.func @transform_2(%arg0: i32) -> (i32, i32) {
    %c0_i32 = arith.constant 0 : i32
    %c0_i32_0 = arith.constant 0 : i32
    %c0_i32_1 = arith.constant 0 : i32
    return %c0_i32, %c0_i32_0 : i32, i32
  }
  func.func @transform_3(%arg0: i32) -> (i32, i32) {
    %c0_i32 = arith.constant 0 : i32
    %c0_i32_0 = arith.constant 0 : i32
    %c0_i32_1 = arith.constant 0 : i32
    return %c0_i32, %c0_i32_0 : i32, i32
  }
  func.func @transform_4(%arg0: i32) -> (i32, i32) {
    %c0_i32 = arith.constant 0 : i32
    %c0_i32_0 = arith.constant 0 : i32
    %c0_i32_1 = arith.constant 0 : i32
    return %c0_i32, %c0_i32_0 : i32, i32
  }
  func.func @transform_5(%arg0: i32) -> (i32, i32) {
    %c0_i32 = arith.constant 0 : i32
    %c0_i32_0 = arith.constant 0 : i32
    %c0_i32_1 = arith.constant 0 : i32
    return %c0_i32, %c0_i32_0 : i32, i32
  }
  func.func @transform_6(%arg0: i32) -> (i32, i32) {
    %c0_i32 = arith.constant 0 : i32
    %c0_i32_0 = arith.constant 0 : i32
    return %arg0, %c0_i32 : i32, i32
  }
}

</mosaic_0001>

<bundles_post_ra>
// kernel: tpu_custom_call.1
= control target key start
LH: loop header
LB: loop body
LE: loop exit
PB: predicated region body
PF: predicated region fallthrough
CT: control target
= control target key end

     0   :  { %11 = vsyncpa [#allocation3], 0  ;;  %s988_s0 = inlined_call_operand.hbm [shape: f32[2,8,32], index: 0, kind: input, shape index: {}]   ;;  %s989_s1 = inlined_call_operand.hbm [shape: f32[2,32], index: 1, kind: input, shape index: {}]   ;;  %s990_s2 = inlined_call_operand.hbm [shape: f32[32,32], index: 2, kind: input, shape index: {}]   ;;  %s991_s3 = inlined_call_operand.hbm [shape: f32[32,32], index: 3, kind: input, shape index: {}]   ;;  %s992_s4 = inlined_call_operand.vmem [shape: f32[1,32], index: 4, kind: input, shape index: {}]   ;;  %s993_s5 = inlined_call_operand.vmem [shape: f32[1,32], index: 5, kind: input, shape index: {}]   ;;  %s994_s6 = inlined_call_operand.hbm [shape: f32[2,32], index: 6, kind: output, shape index: {}]  }
   0x1   :  { %12 = vsyncpa [#allocation6], 0 }
   0x2   :  { %13 = vsyncpa [#allocation9], 0  ;;  %s33_s23 = sshll.u32 %s989_s1, 4  ;;  %s34_s23 = int_to_ptr.hbm [resolvable:$true] %s33_s23 }
   0x3   :  { %14 = vsyncpa [#allocation4], 0  ;;  %s811_s24 = smov [#allocation5]   ;;  %s19_s28 = sshll.u32 %s988_s0, 4  ;;  %s20_s28 = int_to_ptr.hbm [resolvable:$true] %s19_s28 }
   0x4   :  { %s35_s25 = sshll.u32 %s811_s24, 4  ;;  %s812_s29 = smov [#allocation2]   ;;  %s36_s25 = int_to_ptr.vmem [resolvable:$true] %s35_s25 }
   0x5   :  { %38 = dma.hbm_to_vmem [thread:$0]  %s34_s23, 32, %s36_s25, [#allocation6]  }
   0x6   :  { %s21_s30 = sshll.u32 %s812_s29, 4  ;;  %s813_s7 = smov 128   ;;  %s22_s30 = int_to_ptr.vmem [resolvable:$true] %s21_s30 }
   0x7   :  { %s814_s8 = smov 8   ;;  %s43_s1 = sshll.u32 %s990_s2, 4  ;;  %s44_s1 = int_to_ptr.hbm [resolvable:$true] %s43_s1 }
   0x8   :  { %27 = dma.hbm_to_vmem [thread:$0]  %s20_s28, 256, %s22_s30, [#allocation3], %s813_s7, %s813_s7, %s814_s8  }
   0x9   :  { %s815_s11 = smov [#allocation7]   ;;  %s56_s0 = sshll.u32 %s991_s3, 4  ;;  %s57_s0 = int_to_ptr.hbm [resolvable:$true] %s56_s0 }
   0xa   :  { %s45_s12 = sshll.u32 %s815_s11, 4  ;;  %s816_s15 = smov [#allocation8]   ;;  %s46_s12 = int_to_ptr.vmem [resolvable:$true] %s45_s12 }
   0xb   :  { %51 = dma.hbm_to_vmem [thread:$0]  %s44_s1, 512, %s46_s12, [#allocation6], %s813_s7, %s813_s7, %s814_s8  }
   0xc   :  { %s58_s16 = sshll.u32 %s816_s15, 4  ;;  %s59_s16 = int_to_ptr.vmem [resolvable:$true] %s58_s16 }
   0xd   :  { %64 = dma.hbm_to_vmem [thread:$0]  %s57_s0, 512, %s59_s16, [#allocation9], %s813_s7, %s813_s7, %s814_s8  }
   0xe   :  { %803 = dma.done.wait [#allocation3], 256  }
   0xf   :  { %804 = vsyncadd [#allocation3], 4294967040 }
  0x10   :  { %805 = dma.done.wait [#allocation6], 544  }
  0x11   :  { %806 = vsyncadd [#allocation6], 4294966752 }
  0x12   :  { %807 = dma.done.wait [#allocation9], 512  }
  0x13   :  { %808 = vsyncadd [#allocation9], 4294966784  ;;  %vm92_vm0 = vcmask 261120   ;;  %v91_v0 = vld [vmem:[#allocation8 + $0x18] sm:$0xff]  ;;  %v90_v1 = vld [vmem:[#allocation8 + $0x10] sm:$0xff]  ;;  %vm539_vm1 = vcmask 1041409  }
  0x14   :  { %v89_v2 = vld [vmem:[#allocation8 + $0x8] sm:$0xff]  ;;  %v866_v3 = vand.u32 4294901760, %v91_v0  ;;  %v868_v4 = vand.u32 4294901760, %v90_v1  ;;  %v88_v6 = vld [vmem:[#allocation8] sm:$0xff]  ;;  %v318_v8 = vld [vmem:[#allocation7 + $0x18] sm:$0xff]  ;;  %vm542_vm2 = vcmask 58368  }
  0x15   :  { %v870_v5 = vand.u32 4294901760, %v89_v2  ;;  %v872_v7 = vld [vmem:[#allocation2] sm:$0xff]  ;;  %v874_v9 = vand.u32 4294901760, %v88_v6  ;;  %v878_v11 = vand.u32 4294901760, %v318_v8  ;;  %v880_v13 = vld [vmem:[#allocation2 + $0x8] sm:$0xff]  ;;  %v315_v38 = vld [vmem:[#allocation7] sm:$0xff] }
  0x16   :  { %v94_v10 = vsel %vm92_vm0, %v872_v7, 0  ;;  %v317_v12 = vld [vmem:[#allocation7 + $0x10] sm:$0xff]  ;;  %112 = vmatpush.msra.mxu0 %v866_v3  ;;  %v149_v14 = vsub.f32 %v91_v0, %v866_v3  ;;  %v885_v15 = vsub.f32 %v90_v1, %v868_v4  ;;  %229 = vmatpush.msra.mxu3 %v866_v3  ;;  %v97_v21 = vsel %vm92_vm0, %v880_v13, 0  ;;  %v316_v37 = vld [vmem:[#allocation7 + $0x8] sm:$0xff]  ;;  %v87_v39 = vld [vmem:[#allocation5] sm:$0x3] }
  0x17   :  { %v889_v16 = vsub.f32 %v89_v2, %v870_v5  ;;  %v891_v17 = vand.u32 4294901760, %v94_v10  ;;  %v894_v18 = vsub.f32 %v88_v6, %v874_v9  ;;  %v897_v19 = vsub.f32 %v318_v8, %v878_v11  ;;  %s646_s21 = sshll.u32 %s994_s6, 4  ;;  %s647_s21 = int_to_ptr.hbm [resolvable:$true] %s646_s21 }
  0x18   :  { %v899_v20 = vand.u32 4294901760, %v317_v12  ;;  %195 = vmatpush.msra.mxu2 %v149_v14  ;;  %114 = vmatpush.msra.mxu0 %v868_v4  ;;  %v150_v22 = vand.u32 4294901760, %v149_v14  ;;  %v156_v24 = vand.u32 4294901760, %v885_v15  ;;  %v910_v28 = vand.u32 4294901760, %v97_v21 }
  0x19   :  { %v120_v23 = vsub.f32 %v94_v10, %v891_v17  ;;  %v162_v25 = vand.u32 4294901760, %v889_v16  ;;  %231 = vmatpush.msra.mxu3 %v868_v4  ;;  %v369_v26 = vand.u32 4294901760, %v897_v19  ;;  %v168_v27 = vand.u32 4294901760, %v894_v18 }
  0x1a   :  { %v913_v29 = vsub.f32 %v317_v12, %v899_v20  ;;  %198 = vmatpush.msra.mxu2 %v885_v15  ;;  %116 = vmatpush.msra.mxu0 %v870_v5  ;;  %v151_v30 = vsub.f32 %v149_v14, %v150_v22  ;;  %v157_v32 = vsub.f32 %v885_v15, %v156_v24  ;;  %v342_v49 = vand.u32 4294901760, %v316_v37 }
  0x1b   :  { %v121_v31 = vand.u32 4294901760, %v120_v23  ;;  %v163_v33 = vsub.f32 %v889_v16, %v162_v25  ;;  %233 = vmatpush.msra.mxu3 %v870_v5  ;;  %v370_v34 = vsub.f32 %v897_v19, %v369_v26  ;;  %v128_v35 = vsub.f32 %v97_v21, %v910_v28 }
  0x1c   :  { %v375_v36 = vand.u32 4294901760, %v913_v29  ;;  %201 = vmatpush.msra.mxu2 %v889_v16  ;;  %118 = vmatpush.msra.mxu0 %v874_v9  ;;  %v152_v40 = vand.u32 4294901760, %v151_v30  ;;  %v158_v42 = vand.u32 4294901760, %v157_v32  ;;  %v169_v43 = vsub.f32 %v894_v18, %v168_v27  ;;  %v669_v16 = vld [vmem:[%s992_s4] ss:$0 sm:$0xff] }
  0x1d   :  { %v122_v41 = vsub.f32 %v120_v23, %v121_v31  ;;  %235 = vmatpush.msra.mxu3 %v874_v9  ;;  %v164_v44 = vand.u32 4294901760, %v163_v33  ;;  %v371_v45 = vand.u32 4294901760, %v370_v34  ;;  %v129_v46 = vand.u32 4294901760, %v128_v35 }
  0x1e   :  { %264 = vmatpush.msrb.mxu0 %v150_v22  ;;  %v376_v47 = vsub.f32 %v913_v29, %v375_v36  ;;  %153 = vmatpush.msra.mxu1 %v152_v40  ;;  %v933_v50 = vand.u32 4294901760, %v315_v38  ;;  %v324_v51 = vsel %vm92_vm0, %v87_v39, 0  ;;  %v170_v54 = vand.u32 4294901760, %v169_v43 }
  0x1f   :  { %204 = vmatpush.msra.mxu2 %v894_v18  ;;  %v123_v48 = vand.u32 4294901760, %v122_v41  ;;  %239 = vmatmul.f32.vlgmr.msra.gmra.mxu3 %v121_v31  ;;  %v936_v53 = vand.u32 4294901760, %v324_v51  ;;  %v130_v55 = vsub.f32 %v128_v35, %v129_v46  ;;  %v380_v56 = vsub.f32 %v316_v37, %v342_v49 }
  0x20   :  { %207 = vmatmul.f32.vlgmr.msra.gmra.mxu2 %v120_v23  ;;  %v377_v52 = vand.u32 4294901760, %v376_v47  ;;  %159 = vmatpush.msra.mxu1 %v158_v42  ;;  %v386_v57 = vsub.f32 %v315_v38, %v933_v50  ;;  %v670_v47 = vld [vmem:[%s993_s5] ss:$0 sm:$0xff]  ;;  %s818_s5 = smov [#allocation10]   ;;  %vm637_vm11 = vcmask 254976  }
  0x21   :  { %124 = vmatmul.f32.vlgmr.msra.gmra.mxu0 %v123_v48  ;;  %339 = vmatpush.msrb.mxu2 %v878_v11  ;;  %v347_v58 = vsub.f32 %v324_v51, %v936_v53  ;;  %v381_v59 = vand.u32 4294901760, %v380_v56  ;;  %v131_v62 = vand.u32 4294901760, %v130_v55  ;;  %v535_v55 = vlaneseq  ;;  %s644_s18 = sshll.u32 %s818_s5, 4  ;;  %s645_s18 = int_to_ptr.vmem [resolvable:$true] %s644_s18 }
  0x22   :  { %372 = vmatpush.msrb.mxu3 %v371_v45  ;;  %165 = vmatpush.msra.mxu1 %v164_v44  ;;  %v387_v60 = vand.u32 4294901760, %v386_v57 }
  0x23   :  { %268 = vmatpush.msrb.mxu0 %v156_v24  ;;  %341 = vmatpush.msrb.mxu2 %v899_v20  ;;  %v348_v61 = vand.u32 4294901760, %v347_v58  ;;  %v382_v63 = vsub.f32 %v380_v56, %v381_v59 }
  0x24   :  { %378 = vmatpush.msrb.mxu3 %v377_v52  ;;  %171 = vmatpush.msra.mxu1 %v170_v54  ;;  %v388_v0 = vsub.f32 %v386_v57, %v387_v60 }
  0x25   :  { %272 = vmatpush.msrb.mxu0 %v162_v25  ;;  %173 = vmatmul.f32.vlgmr.msra.gmra.mxu1 %v891_v17  ;;  %v383_v1 = vand.u32 4294901760, %v382_v63  ;;  %v349_v2 = vsub.f32 %v347_v58, %v348_v61 }
  0x26   :  { %343 = vmatpush.msrb.mxu2 %v342_v49  ;;  %299 = vmatpush.msrb.mxu1 %v866_v3  ;;  %v389_v6 = vand.u32 4294901760, %v388_v0 }
  0x27   :  { %276 = vmatpush.msrb.mxu0 %v168_v27  ;;  %245 = vmatmul.f32.gmra.mxu3 %v129_v46  ;;  %v350_v8 = vand.u32 4294901760, %v349_v2 }
  0x28   :  { %212 = vmatmul.f32.gmra.mxu2 %v128_v35  ;;  %301 = vmatpush.msrb.mxu1 %v868_v4 }
  0x29   :  { %132 = vmatmul.f32.gmra.mxu0 %v131_v62  ;;  %384 = vmatpush.msrb.mxu3 %v383_v1  ;;  %v817_v62 = vmov 0  }
  0x2a   :  { %345 = vmatpush.msrb.mxu2 %v933_v50  ;;  %303 = vmatpush.msrb.mxu1 %v870_v5 }
  0x2b   :  { %390 = vmatpush.msrb.mxu3 %v389_v6  ;;  %468 = vmatpush.msra.mxu0 %v369_v26 }
  0x2c   :  { %410 = vmatpush.msra.mxu2 %v897_v19  ;;  %305 = vmatpush.msrb.mxu1 %v874_v9 }
  0x2d   :  { %177 = vmatmul.f32.gmra.mxu1 %v910_v28  ;;  %439 = vmatpush.msra.mxu3 %v878_v11 }
  0x2e   :  { %413 = vmatpush.msra.mxu2 %v913_v29  ;;  %499 = vmatpush.msra.mxu1 %v878_v11 }
  0x2f   :  { %392 = vmatmul.f32.vlgmr.msrb.gmra.mxu3 %v936_v53  ;;  %472 = vmatpush.msra.mxu0 %v375_v36 }
  0x30   :  { %416 = vmatpush.msra.mxu2 %v380_v56  ;;  %441 = vmatpush.msra.mxu3 %v899_v20  ;;  %v536_v56 = vand.u32 127, %v535_v55 }
  0x31   :  { %351 = vmatmul.f32.vlgmr.msrb.gmra.mxu2 %v350_v8  ;;  %278 = vmatmul.f32.vlgmr.msrb.gmra.mxu0 %v891_v17 }
  0x32   :  { %419 = vmatpush.msra.mxu2 %v386_v57  ;;  %443 = vmatpush.msra.mxu3 %v342_v49 }
  0x33   :  { %501 = vmatpush.msra.mxu1 %v899_v20  ;;  %476 = vmatpush.msra.mxu0 %v381_v59 }
  0x34   :  { %445 = vmatpush.msra.mxu3 %v933_v50  ;;  %667 = vset.pattern.permute.xlu2 %v817_v62 }
  0x35   :  { %503 = vmatpush.msra.mxu1 %v342_v49  ;;  %480 = vmatpush.msra.mxu0 %v387_v60 }
  0x36   :  { %307 = vmatmul.f32.vlgmr.msrb.gmra.mxu1 %v891_v17  ;;  %666 = vset.pattern.permute.xlu1 %v817_v62 }
  0x37   :  { %505 = vmatpush.msra.mxu1 %v933_v50  ;;  %449 = vmatmul.f32.vlgmr.msra.gmra.mxu3 %v348_v61 }
  0x38   :  { %668 = vset.pattern.permute.xlu0 %v817_v62 }
  0x39   :  { %422 = vmatmul.f32.vlgmr.msra.gmra.mxu2 %v347_v58  ;;  %282 = vmatmul.f32.gmra.mxu0 %v910_v28 }
  0x3e   :  { %311 = vmatmul.f32.gmra.mxu1 %v910_v28 }
  0x41   :  { %482 = vmatmul.f32.vlgmr.msra.gmra.mxu0 %v936_v53 }
  0x46   :  { %507 = vmatmul.f32.vlgmr.msra.gmra.mxu1 %v936_v53 }
  0x9e   :  { %v125_v3 = vpop.f32.mrf.mxu0 }
  0xa2   :  { %v174_v4 = vpop.f32.mrf.mxu1  ;;  %v240_v9 = vpop.f32.mrf.mxu3 }
  0xa3   :  { %v208_v5 = vpop.f32.mrf.mxu2  ;;  %v175_v22 = vadd.f32 %v174_v4, %v125_v3 }
  0xa5   :  { %v209_v29 = vadd.f32 %v208_v5, %v175_v22 }
  0xa6   :  { %v133_v10 = vpop.f32.mrf.mxu0 }
  0xa7   :  { %v241_v33 = vadd.f32 %v240_v9, %v209_v29 }
  0xaa   :  { %v178_v11 = vpop.f32.mrf.mxu1  ;;  %v246_v14 = vpop.f32.mrf.mxu3 }
  0xab   :  { %v213_v12 = vpop.f32.mrf.mxu2  ;;  %v179_v26 = vadd.f32 %v178_v11, %v133_v10 }
  0xad   :  { %v214_v32 = vadd.f32 %v213_v12, %v179_v26 }
  0xae   :  { %v279_v15 = vpop.f32.mrf.mxu0 }
  0xaf   :  { %v247_v36 = vadd.f32 %v246_v14, %v214_v32  ;;  %v280_v37 = vadd.f32 %v279_v15, %v241_v33 }
  0xb2   :  { %v393_v19 = vpop.f32.mrf.mxu3 }
  0xb3   :  { %v308_v17 = vpop.f32.mrf.mxu1 }
  0xb4   :  { %v352_v18 = vpop.f32.mrf.mxu2  ;;  %v309_v39 = vadd.f32 %v308_v17, %v280_v37 }
  0xb5   :  { %v353_v20 = vadd.f32 %v669_v16, %v352_v18 }
  0xb6   :  { %v283_v21 = vpop.f32.mrf.mxu0 }
  0xb7   :  { %v394_v23 = vadd.f32 %v393_v19, %v353_v20  ;;  %v284_v40 = vadd.f32 %v283_v21, %v247_v36 }
  0xba   :  { %v450_v28 = vpop.f32.mrf.mxu3 }
  0xbb   :  { %v312_v24 = vpop.f32.mrf.mxu1 }
  0xbc   :  { %v423_v25 = vpop.f32.mrf.mxu2  ;;  %v313_v43 = vadd.f32 %v312_v24, %v284_v40 }
  0xbd   :  { %v424_v27 = vadd.f32 %v423_v25, %v394_v23 }
  0xbe   :  { %v483_v31 = vpop.f32.mrf.mxu0 }
  0xbf   :  { %v451_v30 = vadd.f32 %v450_v28, %v424_v27 }
  0xc1   :  { %v484_v34 = vadd.f32 %v483_v31, %v451_v30 }
  0xc3   :  { %v508_v35 = vpop.f32.mrf.mxu1 }
  0xc4   :  { %v509_v38 = vadd.f32 %v508_v35, %v484_v34 }
  0xc6   :  { %v512_v41 = vrot.slane %v509_v38, 1  ;;  %v513_v42 = vperm.slane %v509_v38, 0 }
  0xc8   :  { %v514_v44 = vperm.slane %v512_v41, 0  ;;  %v517_v45 = vadd.f32 %v513_v42, %v309_v39 }
  0xca   :  { %v518_v46 = vadd.f32 %v514_v44, %v313_v43  ;;  %671 = vtanh.f32 %v517_v45 }
  0xcc   :  { %673 = vtanh.f32 %v518_v46 }
  0xd0   :  { %v672_v48 = vpop.eup %671 }
  0xd1   :  { %v525_v49 = vmul.f32 %v672_v48, %v670_v47 }
  0xd2   :  { %v674_v51 = vpop.eup %673 }
  0xd3   :  { %v527_v50 = vsel %vm92_vm0, %v525_v49, 0.0  ;;  %v526_v52 = vmul.f32 %v674_v51, %v670_v47 }
  0xd4   :  { %528 = vadd.xlane.f32.xlu0 %v527_v50 }
  0xd5   :  { %v530_v53 = vsel %vm92_vm0, %v526_v52, 0.0 }
  0xdc   :  { %531 = vadd.xlane.f32.xlu0 %v530_v53 }
 0x147   :  { %v529_v54 = vpop.xlane.xlu0 %528 }
 0x148   :  { %v537_v58 = vperm.slane %v529_v54, %v536_v56 }
 0x14f   :  { %v532_v57 = vpop.xlane.xlu0 %531 }
 0x150   :  { %v538_v59 = vperm.slane %v532_v57, %v536_v56 }
 0x152   :  { %v540_v60 = vsel %vm539_vm1, %v538_v59, %v537_v58 }
 0x153   :  { %v543_v61 = vsel %vm542_vm2, %v540_v60, -inf }
 0x154   :  { %544 = vmax.xlane.f32.xlu1 %v543_v61 }
 0x1c7   :  { %v545_v63 = vpop.xlane.xlu1 %544 }
 0x1c8   :  { %v547_v0 = vperm.slane %v545_v63, 0  ;;  %v548_v1 = vperm.slane %v545_v63, 1 }
 0x1ca   :  { %v551_v2 = vsub.f32 %v529_v54, %v547_v0  ;;  %v552_v6 = vsub.f32 %v532_v57, %v548_v1 }
 0x1cc   :  { %v553_v8 = vmul.f32 1.442695, %v551_v2  ;;  %v555_v3 = vmul.f32 1.442695, %v552_v6 }
 0x1ce   :  { %675 = vpow2.f32 %v553_v8 }
 0x1cf   :  { %677 = vpow2.f32 %v555_v3 }
 0x1d4   :  { %v676_v4 = vpop.eup %675 }
 0x1d5   :  { %v678_v5 = vpop.eup %677  ;;  %560 = vperm.xlu1 %666, %v676_v4  }
 0x1d6   :  { %563 = vperm.xlu2 %667, %v678_v5  }
 0x230   :  { %v564_v9 = vpop.permute.xlu2 %563 }
 0x231   :  { %v566_v11 = vperm.slane %v564_v9, %v536_v56 }
 0x247   :  { %v561_v10 = vpop.permute.xlu1 %560 }
 0x248   :  { %v565_v12 = vperm.slane %v561_v10, %v536_v56 }
 0x24a   :  { %v567_v14 = vsel %vm539_vm1, %v566_v11, %v565_v12 }
 0x24b   :  { %v569_v15 = vsel %vm542_vm2, %v567_v14, 0.0 }
 0x24c   :  { %570 = vadd.xlane.f32.xlu2 %v569_v15 }
 0x2bf   :  { %v571_v16 = vpop.xlane.xlu2 %570 }
 0x2c0   :  { %v573_v17 = vperm.slane %v571_v16, 0  ;;  %v574_v18 = vperm.slane %v571_v16, 1 }
 0x2c2   :  { %679 = vrcp.f32 %v573_v17  ;;  %v588_v25 = vand.u32 2147483648, %v573_v17  ;;  %v603_v26 = vand.u32 2147483648, %v574_v18  ;;  %v586_v28 = vand.u32 2147483647, %v573_v17 }
 0x2c3   :  { %681 = vrcp.f32 %v574_v18  ;;  %v601_v30 = vand.u32 2147483647, %v574_v18  ;;  %vm582_vm5 = vweird.f32 %v573_v17  ;;  %vm597_vm6 = vweird.f32 %v574_v18 }
 0x2c4   :  { %v589_v33 = vor.u32 1.1754944e-38, %v588_v25  ;;  %v604_v34 = vor.u32 1.1754944e-38, %v603_v26  ;;  %vm587_vm9 = vcmp.eq.f32.partialorder %v586_v28, 8.507059e+37 }
 0x2c5   :  { %vm602_vm10 = vcmp.eq.f32.partialorder %v601_v30, 8.507059e+37 }
 0x2c8   :  { %v680_v19 = vpop.eup %679 }
 0x2c9   :  { %v682_v20 = vpop.eup %681  ;;  %v578_v21 = vmul.f32 %v680_v19, %v573_v17  ;;  %vm583_vm3 = vweird.f32 %v680_v19 }
 0x2ca   :  { %v593_v22 = vmul.f32 %v682_v20, %v574_v18  ;;  %vm598_vm4 = vweird.f32 %v682_v20  ;;  %vm584_vm7 = vmor %vm582_vm5, %vm583_vm3 }
 0x2cb   :  { %v579_v23 = vsub.f32 1.0, %v578_v21  ;;  %vm599_vm8 = vmor %vm597_vm6, %vm598_vm4 }
 0x2cc   :  { %v594_v24 = vsub.f32 1.0, %v593_v22 }
 0x2cd   :  { %v580_v27 = vmul.f32 %v680_v19, %v579_v23 }
 0x2ce   :  { %v595_v29 = vmul.f32 %v682_v20, %v594_v24 }
 0x2cf   :  { %v581_v31 = vadd.f32 %v680_v19, %v580_v27 }
 0x2d0   :  { %v596_v32 = vadd.f32 %v682_v20, %v595_v29 }
 0x2d1   :  { %v585_v35 = vsel %vm584_vm7, %v680_v19, %v581_v31 }
 0x2d2   :  { %v600_v36 = vsel %vm599_vm8, %v682_v20, %v596_v32  ;;  %v590_v37 = vsel %vm587_vm9, %v589_v33, %v585_v35 }
 0x2d3   :  { %v605_v38 = vsel %vm602_vm10, %v604_v34, %v600_v36  ;;  %v591_v39 = vmul.f32 %v676_v4, %v590_v37 }
 0x2d4   :  { %v606_v40 = vmul.f32 %v678_v5, %v605_v38 }
 0x2d5   :  { %609 = vperm.xlu0 %668, %v591_v39  }
 0x2d6   :  { %614 = vperm.xlu1 %666, %v606_v40  }
 0x347   :  { %v610_v41 = vpop.permute.xlu0 %609 }
 0x348   :  { %v615_v42 = vpop.permute.xlu1 %614  ;;  %v617_v43 = vmul.f32 %v610_v41, %v872_v7 }
 0x349   :  { %v618_v44 = vmul.f32 %v615_v42, %v880_v13 }
 0x34a   :  { %v619_v45 = vsel %vm92_vm0, %v617_v43, 0.0 }
 0x34b   :  { %v626_v46 = vsel %vm92_vm0, %v618_v44, 0.0  ;;  %v620_v47 = vrot.slane %v619_v45, 4 }
 0x34c   :  { %v627_v48 = vrot.slane %v626_v46, 4 }
 0x34d   :  { %v621_v49 = vadd.f32 %v620_v47, %v619_v45 }
 0x34e   :  { %v628_v50 = vadd.f32 %v627_v48, %v626_v46 }
 0x34f   :  { %v622_v51 = vrot.slane %v621_v49, 2 }
 0x350   :  { %v629_v52 = vrot.slane %v628_v50, 2 }
 0x351   :  { %v623_v53 = vadd.f32 %v622_v51, %v621_v49 }
 0x352   :  { %v630_v54 = vadd.f32 %v629_v52, %v628_v50 }
 0x353   :  { %v624_v55 = vrot.slane %v623_v53, 1 }
 0x354   :  { %v631_v56 = vrot.slane %v630_v54, 1 }
 0x355   :  { %v625_v7 = vadd.f32 %v624_v55, %v623_v53 }
 0x356   :  { %v632_v13 = vadd.f32 %v631_v56, %v630_v54 }
 0x358   :  { %v635_v57 = vsel %vm539_vm1, %v632_v13, %v625_v7 }
 0x359   :  { %638 = vst.msk [vmem:[#allocation10] sm:$0x3] %vm637_vm11, %v635_v57 }
 0x35a   :  { %649 = dma.vmem_to_hbm [thread:$0]  %s645_s18, 32, %s647_s21, [#allocation4]  }
 0x35b   :  { %809 = dma.done.wait [#allocation4], 32  }
 0x35c   :  { %810 = vsyncadd [#allocation4], 4294967264 }
 0x35d   :  { %654 = vsyncpa [#allocation3], 1 }
 0x35e   :  { %655 = vsyncpa [#allocation6], 1 }
 0x35f   :  { %656 = vsyncpa [#allocation9], 1 }
 0x360   :  { %657 = vsyncpa [#allocation4], 1 }

</bundles_post_ra>
